<compile_context>
chip_gen: v6e
topology: v6e:2x2x1
jax: 0.10.0
libtpu: 0.0.40
codegen_flags: <defaults>
</compile_context>

<pallas_src>
import math

import jax
import jax.numpy as jnp
from jax import lax
from jax.experimental import pallas as pl
from jax.experimental.pallas import tpu as pltpu


def _round_up(n, m):
    return ((n + m - 1) // m) * m


def _pos_emb_kernel(x_ref, w_ref, out_ref):
    # x_ref  : (tb, 1)  timesteps, batch on the sublane axis.
    # w_ref  : (1, F)   F = 2*half+1, layout [0, w, w] (lane 0 is a dummy 0).
    # out_ref: (tb, F)  final layout: col 0 = x, cols 1..half = sin, rest = cos.
    half = (w_ref.shape[1] - 1) // 2
    x = x_ref[...]                                     # (tb, 1)
    # Same association as the reference: (x * w) * 2*pi.
    theta = (x * w_ref[...]) * (2.0 * math.pi)         # broadcast outer product (tb, F)
    lane = lax.broadcasted_iota(jnp.int32, theta.shape, 1)
    fourier = jnp.where(lane <= half, jnp.sin(theta), jnp.cos(theta))
    x_b = jnp.broadcast_to(x, theta.shape)
    out_ref[...] = jnp.where(lane == 0, x_b, fourier).astype(out_ref.dtype)


def random_or_learned_sinusoidal_pos_emb(x, weights, *, out_dtype=jnp.float32,
                                         force_pallas=False):
    """x: (B,), weights: (half_dim,) -> (B, 2*half_dim + 1).

    Matches the PyTorch module: concat([x, sin(2*pi*x*w), cos(2*pi*x*w)], -1).
    """
    assert x.ndim == 1
    assert weights.ndim == 1
    b = x.shape[0]
    h = weights.shape[0]
    f = 2 * h + 1

    x_f32 = x.astype(jnp.float32)
    w_f32 = weights.astype(jnp.float32)

    # Tiny-shape regime: kernel launch overhead dwarfs the math; stay in XLA.
    # TODO(synk): better still, fuse this as a prologue of the consuming
    # time-MLP kernel (compute sin/cos into VMEM scratch before its matmul).
    if not force_pallas and b * h < (1 << 15):
        freqs = x_f32[:, None] * w_f32[None, :] * (2.0 * math.pi)
        return jnp.concatenate(
            [x_f32[:, None], jnp.sin(freqs), jnp.cos(freqs)], axis=-1
        ).astype(out_dtype)

    # Frequency row laid out to match the output columns:
    # lane 0 dummy (the raw-x column), lanes 1..h sin freqs, lanes h+1..2h cos.
    w_ext = jnp.concatenate(
        [jnp.zeros((1,), jnp.float32), w_f32, w_f32]).reshape(1, f)

    # --- B tiling --------------------------------------------------------
    # Batch lives on the sublane axis; features on lanes.  Per pipeline buffer
    # each B row costs ~lane_pad(F)*4 bytes for the output block plus 128*4
    # bytes for the (tb, 1) x block (its lane dim pads to 128).  Keep the
    # double-buffered working set under ~20 MiB: safe on v7x (64 MiB physical,
    # 32 MiB scoped default) and on v5e/v6e, while big enough that each grid
    # step moves >~1 MB and amortizes the ~0.35 us per-step overhead.
    lane_pad_f = _round_up(f, 128)
    bytes_per_row = (lane_pad_f + 128) * 4 * 2          # x2: double-buffered
    vmem_tile_budget = 20 * 1024 * 1024
    tb_cap = max(8, (vmem_tile_budget // bytes_per_row) // 8 * 8)

    if b <= 1024:
        tb = _round_up(b, 8)                            # single small block
    else:
        # Guarantee >= 2 grid steps so both v7x TensorCores get a shard.
        tb = _round_up(pl.cdiv(b, 2), 8)
    tb = max(8, min(tb, tb_cap))
    b_pad = pl.cdiv(b, tb) * tb

    x_col = x_f32 if b_pad == b else jnp.pad(x_f32, (0, b_pad - b))
    x_col = x_col.reshape(b_pad, 1)

    out = pl.pallas_call(
        _pos_emb_kernel,
        out_shape=jax.ShapeDtypeStruct((b_pad, f), out_dtype),
        grid_spec=pltpu.PrefetchScalarGridSpec(
            num_scalar_prefetch=0,
            grid=(b_pad // tb,),
            in_specs=[
                pl.BlockSpec((tb, 1), lambda i: (i, 0)),   # timesteps (sublanes)
                pl.BlockSpec((1, f), lambda i: (0, 0)),    # extended freq row
            ],
            out_specs=pl.BlockSpec((tb, f), lambda i: (i, 0)),
        ),
        compiler_params=pltpu.CompilerParams(
            # B axis is embarrassingly parallel (shards across TCs on v7x).
            dimension_semantics=("parallel",),
            # Stays within the v7x scoped default; no need to push toward the
            # 64 MiB physical limit.
            vmem_limit_bytes=32 * 1024 * 1024,
        ),
    )(x_col, w_ext)

    return out if b_pad == b else out[:b]


def _reference(x, weights):
    x = x.astype(jnp.float32)
    w = weights.astype(jnp.float32)
    freqs = x[:, None] * w[None, :] * (2.0 * math.pi)
    return jnp.concatenate([x[:, None], jnp.sin(freqs), jnp.cos(freqs)], axis=-1)


if __name__ == "__main__":
    key = jax.random.PRNGKey(0)
    k_x, k_w, k_x2 = jax.random.split(key, 3)

    batch = 8
    dim = 32                      # must be even
    half_dim = dim // 2

    # Deterministic "parameter" init (torch.randn(half_dim) analogue).
    weights = jax.random.normal(k_w, (half_dim,), dtype=jnp.float32)
    x = jax.random.normal(k_x, (batch,), dtype=jnp.float32)

    # 1) Pallas kernel at the small demo shape (forced past the XLA fallback).
    out = random_or_learned_sinusoidal_pos_emb(x, weights, force_pallas=True)
    out = jax.block_until_ready(out)
    ref = _reference(x, weights)
    assert out.shape == (batch, dim + 1)
    assert jnp.allclose(out, ref, atol=1e-5, rtol=1e-5)

    # 2) Small-shape dispatch path (plain-XLA fallback) -- same semantics.
    out_fb = jax.block_until_ready(
        random_or_learned_sinusoidal_pos_emb(x, weights))
    assert jnp.allclose(out_fb, ref, atol=1e-5, rtol=1e-5)

    # 3) Non-multiple-of-8 batch: exercises sublane padding + tail slice.
    x_odd = jax.random.normal(k_x2, (300,), dtype=jnp.float32)
    out_odd = jax.block_until_ready(
        random_or_learned_sinusoidal_pos_emb(x_odd, weights, force_pallas=True))
    assert out_odd.shape == (300, dim + 1)
    assert jnp.allclose(out_odd, _reference(x_odd, weights), atol=1e-5, rtol=1e-5)

    # 4) Larger batch: natural dispatch to the kernel, >= 2 grid steps.
    x_big = jax.random.normal(k_x2, (4096,), dtype=jnp.float32)
    out_big = jax.block_until_ready(
        random_or_learned_sinusoidal_pos_emb(x_big, weights))
    assert out_big.shape == (4096, dim + 1)
    # Looser atol: large |2*pi*x*w| arguments make sin/cos rounding ~few e-5.
    assert jnp.allclose(out_big, _reference(x_big, weights), atol=5e-5, rtol=1e-5)

    print("KERNEL_OK")
</pallas_src>

<mosaic_0001>
module attributes {stable_mosaic.version = 11 : i64} {
  func.func @_pos_emb_kernel(%arg0: i32, %arg1: memref<8x1xf32, #tpu.memory_space<vmem>>, %arg2: memref<1x33xf32, #tpu.memory_space<vmem>>, %arg3: memref<8x33xf32, #tpu.memory_space<vmem>>) attributes {dimension_semantics = [#tpu.dimension_semantics<parallel>], iteration_bounds = array<i64: 1>, scalar_prefetch = 0 : i64, scratch_operands = 0 : i64, tpu.core_type = #tpu.core_type<tc>, window_params = [{transform_indices = @transform_0, window_bounds = array<i64: 8, 1>}, {pipeline_mode = #tpu.pipeline_mode<synchronous>, transform_indices = @transform_1, window_bounds = array<i64: 1, 33>}, {transform_indices = @transform_2, window_bounds = array<i64: 8, 33>}]} {
    %c0 = arith.constant 0 : index
    %c0_0 = arith.constant 0 : index
    %0 = vector.load %arg1[%c0, %c0_0] : memref<8x1xf32, #tpu.memory_space<vmem>>, vector<8x1xf32>
    %c0_1 = arith.constant 0 : index
    %c0_2 = arith.constant 0 : index
    %1 = vector.load %arg2[%c0_1, %c0_2] : memref<1x33xf32, #tpu.memory_space<vmem>>, vector<1x33xf32>
    %2 = vector.broadcast %0 : vector<8x1xf32> to vector<8x33xf32>
    %3 = vector.broadcast %1 : vector<1x33xf32> to vector<8x33xf32>
    %4 = arith.mulf %2, %3 : vector<8x33xf32>
    %cst = arith.constant 6.28318548 : f32
    %5 = vector.broadcast %cst : f32 to vector<8x33xf32>
    %6 = arith.mulf %4, %5 : vector<8x33xf32>
    %7 = tpu.iota {dimensions = array<i32: 1>} : vector<8x33xi32>
    %c16_i32 = arith.constant 16 : i32
    %8 = vector.broadcast %c16_i32 : i32 to vector<8x33xi32>
    %9 = arith.cmpi sle, %7, %8 : vector<8x33xi32>
    %10 = math.sin %6 : vector<8x33xf32>
    %11 = math.cos %6 : vector<8x33xf32>
    %12 = arith.select %9, %10, %11 : vector<8x33xi1>, vector<8x33xf32>
    %13 = vector.shape_cast %0 : vector<8x1xf32> to vector<8x1xf32>
    %14 = vector.broadcast %13 : vector<8x1xf32> to vector<8x33xf32>
    %c0_i32 = arith.constant 0 : i32
    %15 = vector.broadcast %c0_i32 : i32 to vector<8x33xi32>
    %16 = arith.cmpi eq, %7, %15 : vector<8x33xi32>
    %17 = arith.select %16, %14, %12 : vector<8x33xi1>, vector<8x33xf32>
    %c0_3 = arith.constant 0 : index
    %c0_4 = arith.constant 0 : index
    %18 = vector.load %arg3[%c0_3, %c0_4] : memref<8x33xf32, #tpu.memory_space<vmem>>, vector<8x33xf32>
    tpu.vector_store %arg3[%c0_3, %c0_4], %17 {strides = array<i32>} : memref<8x33xf32, #tpu.memory_space<vmem>>, vector<8x33xf32>,
    return
  }
  func.func @transform_0(%arg0: i32) -> (i32, i32) {
    %c0_i32 = arith.constant 0 : i32
    %c0_i32_0 = arith.constant 0 : i32
    return %arg0, %c0_i32 : i32, i32
  }
  func.func @transform_1(%arg0: i32) -> (i32, i32) {
    %c0_i32 = arith.constant 0 : i32
    %c0_i32_0 = arith.constant 0 : i32
    %c0_i32_1 = arith.constant 0 : i32
    return %c0_i32, %c0_i32_0 : i32, i32
  }
  func.func @transform_2(%arg0: i32) -> (i32, i32) {
    %c0_i32 = arith.constant 0 : i32
    %c0_i32_0 = arith.constant 0 : i32
    return %arg0, %c0_i32 : i32, i32
  }
}

</mosaic_0001>

<bundles_post_ra>
// kernel: tpu_custom_call.1
= control target key start
LH: loop header
LB: loop body
LE: loop exit
PB: predicated region body
PF: predicated region fallthrough
CT: control target
= control target key end

     0   :  { %v304_v1 = vmov 0   ;;  %s362_s0 = inlined_call_operand.vmem [shape: f32[8,1], index: 0, kind: input, shape index: {}]   ;;  %s363_s1 = inlined_call_operand.vmem [shape: f32[1,33], index: 1, kind: input, shape index: {}]   ;;  %s364_s2 = inlined_call_operand.hbm [shape: f32[8,33], index: 2, kind: output, shape index: {}]  }
   0x1   :  { %v12_v0 = vld [vmem:[%s362_s0] sm:$0xff]  ;;  %277 = vset.pattern.permute.xlu0 %v304_v1 }
   0x2   :  { %16 = vperm.xlu0 %277, %v12_v0  }
   0x3   :  { %7 = vsyncpa [#allocation3], 0  ;;  %v256_v2 = vld [vmem:[%s363_s1] ss:$0 sm:$0xff]  ;;  %v305_v16 = vmov 683565275  }
   0x4   :  { %v306_v18 = vmov 2475754826   ;;  %v307_v21 = vmov 2131351028   ;;  %v308_v24 = vmov 2102212464  }
   0x5   :  { %v309_v27 = vmov 920167782   ;;  %v310_v30 = vmov 1326507024   ;;  %s311_s0 = smov [#allocation2]  }
   0x6   :  { %s248_s1 = sshll.u32 %s311_s0, 4  ;;  %s249_s1 = int_to_ptr.vmem [resolvable:$true] %s248_s1 }
   0x7   :  { %s282_s13 = scalar_lea.vmem %s249_s1, 128  ;;  %p287_p1 = scmp.lt.s32.totalorder %s249_s1, %s249_s1 }
   0x8   :  { %p283_p0 = scmp.ne.s32.totalorder %s249_s1, %s282_s13  ;;  %p288_p2 = scmp.lt.s32.totalorder %s282_s13, %s282_s13 }
   0xa   :  { %p289_p3 = por %p288_p2, %p287_p1 }
   0xc   :  { %p290_p4 = pnand %p289_p3, %p283_p0 }
  0x7d   :  { %v333_v3 = vpop.permute.xlu0 %16 }
  0x7e   :  { %v25_v4 = vmul.f32 %v256_v2, %v333_v3 }
  0x80   :  { %v336_v5 = vmul.f32 6.2831855, %v25_v4 }
  0x82   :  { %v33_v6 = vand.u32 2139095040, %v336_v5  ;;  %v30_v10 = vand.u32 2147483647, %v336_v5  ;;  %vm32_vm7 = vcmp.lt.s32.totalorder %v336_v5, 0 }
  0x84   :  { %v34_v7 = vshrl.u32 %v33_v6, 23  ;;  %v37_v13 = vand.u32 8388607, %v30_v10  ;;  %vm31_vm8 = vcmp.le.f32.partialorder %v30_v10, 0.7853982 }
  0x86   :  { %v257_v8 = vadd.s32 4294967169, %v34_v7  ;;  %v38_v32 = vor.u32 8388608, %v37_v13 }
  0x88   :  { %v40_v9 = vadd.s32 1, %v257_v8  ;;  %v78_v46 = vshll.u32 %v38_v32, 8 }
  0x8a   :  { %vm41_vm0 = vcmp.gt.s32.totalorder %v40_v9, 0 }
  0x8b   :  { %v42_v11 = vsel %vm41_vm0, %v40_v9, 0 }
  0x8c   :  { %v44_v12 = vand.u32 31, %v42_v11  ;;  %v43_v15 = vshrl.u32 %v42_v11, 5 }
  0x8e   :  { %v45_v14 = vsub.s32 32, %v44_v12  ;;  %v47_v17 = vshll.u32 %v305_v16, %v44_v12  ;;  %v50_v19 = vshll.u32 %v306_v18, %v44_v12  ;;  %v53_v23 = vshll.u32 %v307_v21, %v44_v12 }
  0x8f   :  { %v56_v26 = vshll.u32 %v308_v24, %v44_v12  ;;  %v59_v29 = vshll.u32 %v309_v27, %v44_v12  ;;  %vm62_vm1 = vcmp.lt.s32.totalorder %v43_v15, 1  ;;  %vm65_vm2 = vcmp.lt.s32.totalorder %v43_v15, 4 }
  0x90   :  { %v48_v20 = vshrl.u32 %v306_v18, %v45_v14  ;;  %v51_v22 = vshrl.u32 %v307_v21, %v45_v14  ;;  %v54_v25 = vshrl.u32 %v308_v24, %v45_v14  ;;  %v57_v28 = vshrl.u32 %v309_v27, %v45_v14 }
  0x91   :  { %v60_v31 = vshrl.u32 %v310_v30, %v45_v14  ;;  %v46_v41 = vshrl.u32 %v305_v16, %v45_v14  ;;  %vm64_vm3 = vcmp.lt.s32.totalorder %v43_v15, 3  ;;  %vm63_vm4 = vcmp.lt.s32.totalorder %v43_v15, 2 }
  0x92   :  { %v49_v33 = vor.u32 %v48_v20, %v47_v17  ;;  %v52_v34 = vor.u32 %v51_v22, %v50_v19  ;;  %v55_v35 = vor.u32 %v54_v25, %v53_v23  ;;  %v58_v36 = vor.u32 %v57_v28, %v56_v26 }
  0x93   :  { %v61_v37 = vor.u32 %v60_v31, %v59_v29  ;;  %v27_v26 = vlaneseq }
  0x94   :  { %v67_v38 = vsel %vm65_vm2, %v55_v35, 2102212464  ;;  %v70_v39 = vsel %vm62_vm1, %v49_v33, %v52_v34  ;;  %v74_v40 = vsel %vm62_vm1, %v52_v34, %v55_v35  ;;  %v71_v42 = vsel %vm65_vm2, %v58_v36, 920167782 }
  0x95   :  { %v75_v43 = vsel %vm65_vm2, %v61_v37, 1326507024  ;;  %v72_v44 = vsel %vm64_vm3, %v55_v35, %v71_v42  ;;  %v66_v47 = vsel %vm62_vm1, %v46_v41, %v49_v33  ;;  %v68_v48 = vsel %vm64_vm3, %v52_v34, %v67_v38 }
  0x96   :  { %v76_v45 = vsel %vm64_vm3, %v58_v36, %v75_v43  ;;  %v73_v49 = vsel %vm63_vm4, %v70_v39, %v72_v44  ;;  %v69_v55 = vsel %vm63_vm4, %v66_v47, %v68_v48  ;;  %v28_v28 = vand.u32 127, %v27_v26 }
  0x97   :  { %v77_v50 = vsel %vm63_vm4, %v74_v40, %v76_v45  ;;  %v345_v53 = vmul.u32.u64.low %v78_v46, %v73_v49  ;;  %v346_v54 = vmul.u32.u64.high %v78_v46, %v73_v49, %v345_v53  ;;  %v85_v57 = vmul.u32 %v78_v46, %v69_v55 }
  0x98   :  { %v342_v51 = vmul.u32.u64.low %v78_v46, %v77_v50  ;;  %v343_v52 = vmul.u32.u64.high %v78_v46, %v77_v50, %v342_v51  ;;  %vm29_vm9 = vcmp.le.s32.totalorder %v28_v28, 16  ;;  %vm238_vm0 = vcmp.eq.s32.totalorder %v28_v28, 0 }
  0x99   :  { %v88_v56 = vadd.s32 1, %v346_v54  ;;  %vm122_vm1 = vweird.f32 %v336_v5  ;;  %vm240_vm2 = vcmask 269312  }
  0x9a   :  { %vm87_vm5 = vc.u32 %v343_v52, %v345_v53  ;;  %v86_v7 = vadd.s32 %v345_v53, %v343_v52 }
  0x9b   :  { %v89_v58 = vsel %vm87_vm5, %v88_v56, %v346_v54 }
  0x9c   :  { %v90_v59 = vadd.s32 %v89_v58, %v85_v57 }
  0x9e   :  { %v91_v60 = vadd.s32 536870912, %v90_v59 }
  0xa0   :  { %v92_v61 = vshrl.u32 %v91_v60, 30 }
  0xa2   :  { %v93_v62 = vshll.u32 %v92_v61, 30  ;;  %v116_v21 = vsub.s32 4, %v92_v61 }
  0xa4   :  { %v94_v63 = vsub.s32 %v90_v59, %v93_v62  ;;  %v117_v24 = vsel %vm32_vm7, %v116_v21, %v92_v61 }
  0xa5   :  { %v119_v25 = vsel %vm31_vm8, 0, %v117_v24 }
  0xa6   :  { %v96_v0 = vsub.s32 0, %v94_v63  ;;  %v123_v27 = vadd.s32 3, %v119_v25  ;;  %v227_v30 = vand.u32 3, %v119_v25 }
  0xa8   :  { %v258_v1 = vmin.u32 %v96_v0, %v94_v63  ;;  %v124_v29 = vand.u32 3, %v123_v27  ;;  %vm232_vm11 = vcmp.eq.s32.totalorder %v227_v30, 2  ;;  %vm229_vm13 = vcmp.eq.s32.totalorder %v227_v30, 0 }
  0xa9   :  { %vm228_vm15 = vcmp.lt.s32.totalorder %v227_v30, 2 }
  0xaa   :  { %v98_v2 = vclz %v258_v1  ;;  %vm129_vm10 = vcmp.eq.s32.totalorder %v124_v29, 2  ;;  %vm126_vm12 = vcmp.eq.s32.totalorder %v124_v29, 0  ;;  %vm125_vm14 = vcmp.lt.s32.totalorder %v124_v29, 2 }
  0xac   :  { %v259_v4 = vadd.s32 4294967294, %v98_v2 }
  0xae   :  { %vm260_vm6 = vcmp.lt.s32.totalorder %v259_v4, 0 }
  0xaf   :  { %v101_v6 = vsel %vm260_vm6, 0, %v259_v4 }
  0xb0   :  { %v102_v8 = vsub.s32 32, %v101_v6  ;;  %v106_v9 = vsub.s32 4294967266, %v101_v6  ;;  %v103_v11 = vshll.u32 %v94_v63, %v101_v6 }
  0xb2   :  { %v104_v12 = vshrl.u32 %v86_v7, %v102_v8  ;;  %v107_v13 = vadd.s32 127, %v106_v9 }
  0xb4   :  { %v105_v14 = vor.u32 %v104_v12, %v103_v11  ;;  %v108_v15 = vshll.u32 %v107_v13, 23 }
  0xb6   :  { %v109_v16 = vor.u32 4788187, %v108_v15  ;;  %v112_v18 = vcvt.s32.f32 %v105_v14 }
  0xb8   :  { %v110_v17 = vand.u32 2147483647, %v109_v16 }
  0xba   :  { %v113_v19 = vmul.f32 %v112_v18, %v110_v17 }
  0xbc   :  { %v114_v20 = vxor.u32 2147483648, %v113_v19 }
  0xbe   :  { %v115_v22 = vsel %vm32_vm7, %v114_v20, %v113_v19 }
  0xbf   :  { %v118_v23 = vsel %vm31_vm8, %v336_v5, %v115_v22 }
  0xc0   :  { %278 = vcosq.f32 %v118_v23 }
  0xc1   :  { %280 = vsinq.f32 %v118_v23 }
  0xcd   :  { %v279_v31 = vpop.eup %278 }
  0xce   :  { %v281_v32 = vpop.eup %280  ;;  %v130_v33 = vxor.u32 2147483648, %v279_v31 }
  0xcf   :  { %v127_v34 = vxor.u32 2147483648, %v281_v32 }
  0xd0   :  { %v131_v10 = vsel %vm129_vm10, %v130_v33, %v281_v32  ;;  %v234_v35 = vsel %vm232_vm11, %v130_v33, %v281_v32 }
  0xd1   :  { %v128_v36 = vsel %vm126_vm12, %v279_v31, %v127_v34  ;;  %v231_v37 = vsel %vm229_vm13, %v279_v31, %v127_v34 }
  0xd2   :  { %v132_v38 = vsel %vm125_vm14, %v128_v36, %v131_v10  ;;  %v235_v39 = vsel %vm228_vm15, %v231_v37, %v234_v35 }
  0xd3   :  { %v133_v40 = vsel %vm122_vm1, nan, %v132_v38  ;;  %v236_v41 = vsel %vm122_vm1, nan, %v235_v39 }
  0xd4   :  { %v237_v42 = vsel %vm29_vm9, %v133_v40, %v236_v41 }
  0xd5   :  { %v239_v43 = vsel %vm238_vm0, %v333_v3, %v237_v42 }
  0xd6   :  { %241 = vst.msk [vmem:[#allocation2] sm:$0xff] %vm240_vm2, %v239_v43 }
  0xd7   :  { %293 = shalt.err (!%p290_p4)
}
  0xd8   :  { %251 = dma.vmem_to_hbm [thread:$0]  %s249_s1, 128, %s364_s2, [#allocation3]  }
  0xd9   :  { %302 = dma.done.wait [#allocation3], 128  }
  0xda   :  { %303 = vsyncadd [#allocation3], 4294967168 }
  0xdb   :  { %255 = vsyncpa [#allocation3], 1 }

</bundles_post_ra>
